<compile_context>
chip_gen: v6e
topology: v6e:2x2x1
jax: 0.10.0
libtpu: 0.0.40
codegen_flags: <defaults>
</compile_context>

<pallas_src>
import functools

import jax
import jax.numpy as jnp
from jax import lax
from jax.experimental import pallas as pl
from jax.experimental.pallas import tpu as pltpu


_LANE_PAD = 128  # lane-dense output width for the fc2 result


# ---------------------------------------------------------------------------
# Fused Pallas kernel
# ---------------------------------------------------------------------------

def _gat_forward_kernel(
    x_ref, adj_ref,
    w_stack_ref, a1_stack_ref, a2_stack_ref,        # head-major per-head params
    wout_stack_ref, a1o_ref, a2o_ref,               # output GAT layer params
    fc1_w_ref, fc1_b_ref, fc2_w_ref, fc2_b_ref,     # MLP head (fc2 lane-padded)
    out_ref,
    *, num_heads,
):
    x = x_ref[...]                        # (N, Fin)
    adj_mask = adj_ref[...] > 0           # (N, N)

    def attend(h, a1_row, a2_row):
        """Masked-softmax attention + ELU for one GAT layer, h: (N, F)."""
        # e[i, j] = leaky_relu(a1 . h[i] + a2 . h[j]) -- VPU mul + XLU reduce,
        # no MXU pass for the 1-wide projections.
        f1 = jnp.sum(h * a1_row, axis=-1, keepdims=True)        # (N, 1)
        f2 = jnp.sum(h * a2_row, axis=-1, keepdims=True)        # (N, 1)
        e = f1 + jnp.transpose(f2)                              # (N, N)
        e = jnp.maximum(e, 0.01 * e)                            # leaky_relu (torch default slope 0.01)

        att = jnp.where(adj_mask, e, jnp.full_like(e, -9.0e15))
        att = att - jnp.max(att, axis=1, keepdims=True)
        p = jnp.exp(att)
        p = p / jnp.sum(p, axis=1, keepdims=True)               # exact softmax normalization
        # TODO(synk): dropout on attention weights omitted (inference -> identity).

        hp = jnp.dot(p, h, preferred_element_type=jnp.float32)  # (N, F)
        # ELU(alpha=1); clamp before exp so the discarded branch stays finite.
        return jnp.where(hp > 0, hp, jnp.exp(jnp.minimum(hp, 0.0)) - 1.0)

    # --- multi-head attention, head-major: no lane slicing, no concat ---
    # xcat @ W_out is distributed over heads: ho = sum_h attend(x@W_h) @ Wout_h
    ho = None
    for hd in range(num_heads):
        h_h = jnp.dot(x, w_stack_ref[hd], preferred_element_type=jnp.float32)       # (N, Fhid)
        y_h = attend(h_h, a1_stack_ref[hd], a2_stack_ref[hd])                       # (N, Fhid)
        contrib = jnp.dot(y_h, wout_stack_ref[hd], preferred_element_type=jnp.float32)  # (N, Fout)
        ho = contrib if ho is None else ho + contrib

    # --- output GAT layer ---
    xo = attend(ho, a1o_ref[...], a2o_ref[...])                                     # (N, Fout)

    # (The reference computes x1 = x0 + xo, but x1 only feeds the dead x2
    #  branch; the returned value depends on xo only.)

    # --- MLP head: fc1 -> exact GELU (nn.GELU default) -> fc2, dropout identity ---
    h1 = jnp.dot(xo, fc1_w_ref[...], preferred_element_type=jnp.float32) + fc1_b_ref[...]
    h1 = 0.5 * h1 * (1.0 + lax.erf(h1 * jnp.float32(0.7071067811865476)))
    # fc2 weights/bias are zero-padded to 128 lanes -> lane-dense unmasked stores.
    out_ref[...] = (
        jnp.dot(h1, fc2_w_ref[...], preferred_element_type=jnp.float32) + fc2_b_ref[...]
    )


# ---------------------------------------------------------------------------
# One-time parameter packing (off the hot path)
# ---------------------------------------------------------------------------

def prepare_params(params):
    """Packs module parameters into kernel-friendly layouts. Run ONCE at init;
    the forward pass hands these arrays straight to pallas_call with no
    per-call concat/stack/pad XLA ops."""
    attentions = params["attentions"]
    num_heads = len(attentions)
    hidden = attentions[0][0].shape[1]

    w_stack = jnp.stack([W for (W, _) in attentions], axis=0)                       # (H, Fin, Fhid)
    a1_stack = jnp.stack([a[:hidden, 0][None, :] for (_, a) in attentions], axis=0)  # (H, 1, Fhid)
    a2_stack = jnp.stack([a[hidden:, 0][None, :] for (_, a) in attentions], axis=0)  # (H, 1, Fhid)

    out_W = params["out_W"]                                                          # (H*Fhid, Fout)
    f_out = out_W.shape[1]
    wout_stack = out_W.reshape(num_heads, hidden, f_out)                             # (H, Fhid, Fout)
    a1o = jnp.transpose(params["out_a"][:f_out, :])                                  # (1, Fout)
    a2o = jnp.transpose(params["out_a"][f_out:, :])                                  # (1, Fout)

    fc2_w = params["fc2_w"]
    fc2_b = params["fc2_b"]
    fc2_out = fc2_w.shape[1]
    fc2_w_pad = jnp.zeros((fc2_w.shape[0], _LANE_PAD), jnp.float32).at[:, :fc2_out].set(fc2_w)
    fc2_b_pad = jnp.zeros((1, _LANE_PAD), jnp.float32).at[:, :fc2_out].set(fc2_b)

    packed = {
        "w_stack": w_stack, "a1_stack": a1_stack, "a2_stack": a2_stack,
        "wout_stack": wout_stack, "a1o": a1o, "a2o": a2o,
        "fc1_w": params["fc1_w"], "fc1_b": params["fc1_b"],
        "fc2_w_pad": fc2_w_pad, "fc2_b_pad": fc2_b_pad,
    }
    packed = jax.tree_util.tree_map(jnp.asarray, packed)   # materialize once on device
    packed["fc2_out"] = int(fc2_out)
    packed["num_heads"] = int(num_heads)
    return packed


# ---------------------------------------------------------------------------
# Forward wrapper (hot path: pallas_call only)
# ---------------------------------------------------------------------------

def graph_attention_network(x, adj, packed):
    """Mirrors GraphAttentionNetwork.forward (inference mode), fully fused."""
    N = x.shape[0]
    num_heads = packed["num_heads"]
    fc2_out = packed["fc2_out"]

    operands = (
        x, adj,
        packed["w_stack"], packed["a1_stack"], packed["a2_stack"],
        packed["wout_stack"], packed["a1o"], packed["a2o"],
        packed["fc1_w"], packed["fc1_b"], packed["fc2_w_pad"], packed["fc2_b_pad"],
    )

    # Explicit scoped-VMEM limit sized from the actual buffers (with margin),
    # clamped under every generation's physical capacity (v7x: 64 MiB).
    op_bytes = sum(int(o.size) * o.dtype.itemsize for o in operands)
    out_bytes = N * _LANE_PAD * 4
    inter_bytes = 4 * (6 * N * N + 16 * N * _LANE_PAD)
    vmem_limit = int(min(64 << 20, max(4 << 20, 2 * (op_bytes + out_bytes + inter_bytes))))

    kernel = functools.partial(_gat_forward_kernel, num_heads=num_heads)

    y_pad = pl.pallas_call(
        kernel,
        out_shape=jax.ShapeDtypeStruct((N, _LANE_PAD), jnp.float32),
        compiler_params=pltpu.CompilerParams(vmem_limit_bytes=vmem_limit),
    )(*operands)

    y = y_pad[:, :fc2_out]                               # (N, 1) when pred=True
    # torch's x.squeeze(0): only squeezes if the leading dim is 1
    if y.shape[0] == 1:
        y = y[0]
    return y


# ---------------------------------------------------------------------------
# Deterministic parameter init (shapes follow the module's __init__)
# ---------------------------------------------------------------------------

def _xavier_uniform(key, shape, gain=1.414):
    fan_in, fan_out = shape[0], shape[1]
    bound = gain * (6.0 / (fan_in + fan_out)) ** 0.5
    return jax.random.uniform(key, shape, jnp.float32, -bound, bound)


def _linear_init(key, fan_in, fan_out):
    kw, kb = jax.random.split(key)
    bound = 1.0 / (fan_in ** 0.5)
    w = jax.random.uniform(kw, (fan_in, fan_out), jnp.float32, -bound, bound)
    b = jax.random.uniform(kb, (1, fan_out), jnp.float32, -bound, bound)
    return w, b


def init_params(key, in_features, hidden_features, out_features, num_heads, pred=True):
    keys = jax.random.split(key, 2 * num_heads + 4)
    attentions = []
    for h in range(num_heads):
        W = _xavier_uniform(keys[2 * h], (in_features, hidden_features))
        a = _xavier_uniform(keys[2 * h + 1], (2 * hidden_features, 1))
        attentions.append((W, a))
    out_W = _xavier_uniform(keys[2 * num_heads], (num_heads * hidden_features, out_features))
    out_a = _xavier_uniform(keys[2 * num_heads + 1], (2 * out_features, 1))
    fc1_w, fc1_b = _linear_init(keys[2 * num_heads + 2], in_features, hidden_features)
    fc2_out = 1 if pred else in_features
    fc2_w, fc2_b = _linear_init(keys[2 * num_heads + 3], hidden_features, fc2_out)
    return {
        "attentions": attentions,
        "out_W": out_W,
        "out_a": out_a,
        "fc1_w": fc1_w,
        "fc1_b": fc1_b,
        "fc2_w": fc2_w,
        "fc2_b": fc2_b,
    }


# ---------------------------------------------------------------------------
# Main
# ---------------------------------------------------------------------------

if __name__ == "__main__":
    key = jax.random.PRNGKey(0)
    k_x, k_adj, k_p = jax.random.split(key, 3)

    N = 8                   # number of graph nodes
    in_features = 16
    hidden_features = 16
    out_features = 16       # must equal in_features (x0 + x residual in the reference)
    num_heads = 2
    pred = True

    x = jax.random.normal(k_x, (N, in_features), jnp.float32)
    adj = (jax.random.uniform(k_adj, (N, N)) > 0.5).astype(jnp.float32)
    adj = adj + jnp.eye(N, dtype=jnp.float32)   # every node attends to itself

    params = init_params(k_p, in_features, hidden_features, out_features, num_heads, pred)
    packed = prepare_params(params)             # one-time packing, off the hot path

    out = graph_attention_network(x, adj, packed)
    out = jax.block_until_ready(out)
    assert out.shape == (N, 1)
    assert bool(jnp.all(jnp.isfinite(out)))
    print("KERNEL_OK")
</pallas_src>

<mosaic_0001>
module attributes {stable_mosaic.version = 11 : i64} {
  func.func @_gat_forward_kernel(%arg0: memref<8x16xf32, #tpu.memory_space<vmem>>, %arg1: memref<8x8xf32, #tpu.memory_space<vmem>>, %arg2: memref<2x16x16xf32, #tpu.memory_space<vmem>>, %arg3: memref<2x1x16xf32, #tpu.memory_space<vmem>>, %arg4: memref<2x1x16xf32, #tpu.memory_space<vmem>>, %arg5: memref<2x16x16xf32, #tpu.memory_space<vmem>>, %arg6: memref<1x16xf32, #tpu.memory_space<vmem>>, %arg7: memref<1x16xf32, #tpu.memory_space<vmem>>, %arg8: memref<16x16xf32, #tpu.memory_space<vmem>>, %arg9: memref<1x16xf32, #tpu.memory_space<vmem>>, %arg10: memref<16x128xf32, #tpu.memory_space<vmem>>, %arg11: memref<1x128xf32, #tpu.memory_space<vmem>>, %arg12: memref<8x128xf32, #tpu.memory_space<vmem>>) attributes {dimension_semantics = [], scalar_prefetch = 0 : i64, scratch_operands = 0 : i64, tpu.core_type = #tpu.core_type<tc>} {
    %c0 = arith.constant 0 : index
    %c0_0 = arith.constant 0 : index
    %0 = vector.load %arg0[%c0, %c0_0] : memref<8x16xf32, #tpu.memory_space<vmem>>, vector<8x16xf32>
    %c0_1 = arith.constant 0 : index
    %c0_2 = arith.constant 0 : index
    %1 = vector.load %arg1[%c0_1, %c0_2] : memref<8x8xf32, #tpu.memory_space<vmem>>, vector<8x8xf32>
    %cst = arith.constant 0.000000e+00 : f32
    %2 = vector.broadcast %cst : f32 to vector<8x8xf32>
    %3 = arith.cmpf ogt, %1, %2 : vector<8x8xf32>
    %c0_3 = arith.constant 0 : index
    %c0_4 = arith.constant 0 : index
    %c0_5 = arith.constant 0 : index
    %4 = vector.load %arg2[%c0_3, %c0_4, %c0_5] : memref<2x16x16xf32, #tpu.memory_space<vmem>>, vector<1x16x16xf32>
    %5 = vector.shape_cast %4 : vector<1x16x16xf32> to vector<16x16xf32>
    %cst_6 = arith.constant dense<0.000000e+00> : vector<8x16xf32>
    %6 = tpu.matmul %0, %5, %cst_6 {dimension_numbers = #tpu.dot_dimension_numbers<[1], [0], [0], [1], [0, 0, 1, 1], [], []>} : vector<8x16xf32>, vector<16x16xf32>, vector<8x16xf32> -> vector<8x16xf32>
    %c0_7 = arith.constant 0 : index
    %c0_8 = arith.constant 0 : index
    %c0_9 = arith.constant 0 : index
    %7 = vector.load %arg3[%c0_7, %c0_8, %c0_9] : memref<2x1x16xf32, #tpu.memory_space<vmem>>, vector<1x1x16xf32>
    %8 = vector.shape_cast %7 : vector<1x1x16xf32> to vector<1x16xf32>
    %c0_10 = arith.constant 0 : index
    %c0_11 = arith.constant 0 : index
    %c0_12 = arith.constant 0 : index
    %9 = vector.load %arg4[%c0_10, %c0_11, %c0_12] : memref<2x1x16xf32, #tpu.memory_space<vmem>>, vector<1x1x16xf32>
    %10 = vector.shape_cast %9 : vector<1x1x16xf32> to vector<1x16xf32>
    %11 = vector.broadcast %8 : vector<1x16xf32> to vector<8x16xf32>
    %12 = arith.mulf %6, %11 : vector<8x16xf32>
    %cst_13 = arith.constant dense<0.000000e+00> : vector<8xf32>
    %13 = vector.multi_reduction <add>, %12, %cst_13 [1] : vector<8x16xf32> to vector<8xf32>
    %14 = vector.shape_cast %13 : vector<8xf32> to vector<8x1xf32>
    %15 = vector.broadcast %10 : vector<1x16xf32> to vector<8x16xf32>
    %16 = arith.mulf %6, %15 : vector<8x16xf32>
    %cst_14 = arith.constant dense<0.000000e+00> : vector<8xf32>
    %17 = vector.multi_reduction <add>, %16, %cst_14 [1] : vector<8x16xf32> to vector<8xf32>
    %18 = vector.shape_cast %17 : vector<8xf32> to vector<8x1xf32>
    %19 = tpu.transpose %18, [1, 0] : vector<8x1xf32> -> vector<1x8xf32>
    %20 = vector.broadcast %14 : vector<8x1xf32> to vector<8x8xf32>
    %21 = vector.broadcast %19 : vector<1x8xf32> to vector<8x8xf32>
    %22 = arith.addf %20, %21 : vector<8x8xf32>
    %cst_15 = arith.constant 0.00999999977 : f32
    %23 = vector.broadcast %cst_15 : f32 to vector<8x8xf32>
    %24 = arith.mulf %23, %22 : vector<8x8xf32>
    %25 = arith.maximumf %22, %24 : vector<8x8xf32>
    %cst_16 = arith.constant -9.000000e+15 : f32
    %26 = vector.broadcast %cst_16 : f32 to vector<8x8xf32>
    %27 = arith.select %3, %25, %26 : vector<8x8xi1>, vector<8x8xf32>
    %cst_17 = arith.constant dense<0xFF800000> : vector<8xf32>
    %28 = vector.multi_reduction <maximumf>, %27, %cst_17 [1] : vector<8x8xf32> to vector<8xf32>
    %29 = vector.shape_cast %28 : vector<8xf32> to vector<8x1xf32>
    %30 = vector.broadcast %29 : vector<8x1xf32> to vector<8x8xf32>
    %31 = arith.subf %27, %30 : vector<8x8xf32>
    %32 = math.exp %31 : vector<8x8xf32>
    %cst_18 = arith.constant dense<0.000000e+00> : vector<8xf32>
    %33 = vector.multi_reduction <add>, %32, %cst_18 [1] : vector<8x8xf32> to vector<8xf32>
    %34 = vector.shape_cast %33 : vector<8xf32> to vector<8x1xf32>
    %35 = vector.broadcast %34 : vector<8x1xf32> to vector<8x8xf32>
    %36 = arith.divf %32, %35 : vector<8x8xf32>
    %cst_19 = arith.constant dense<0.000000e+00> : vector<8x16xf32>
    %37 = tpu.matmul %36, %6, %cst_19 {dimension_numbers = #tpu.dot_dimension_numbers<[1], [0], [0], [1], [0, 0, 1, 1], [], []>} : vector<8x8xf32>, vector<8x16xf32>, vector<8x16xf32> -> vector<8x16xf32>
    %cst_20 = arith.constant 0.000000e+00 : f32
    %38 = vector.broadcast %cst_20 : f32 to vector<8x16xf32>
    %39 = arith.cmpf ogt, %37, %38 : vector<8x16xf32>
    %cst_21 = arith.constant 0.000000e+00 : f32
    %40 = vector.broadcast %cst_21 : f32 to vector<8x16xf32>
    %41 = arith.minimumf %37, %40 : vector<8x16xf32>
    %42 = math.exp %41 : vector<8x16xf32>
    %cst_22 = arith.constant 1.000000e+00 : f32
    %43 = vector.broadcast %cst_22 : f32 to vector<8x16xf32>
    %44 = arith.subf %42, %43 : vector<8x16xf32>
    %45 = arith.select %39, %37, %44 : vector<8x16xi1>, vector<8x16xf32>
    %c0_23 = arith.constant 0 : index
    %c0_24 = arith.constant 0 : index
    %c0_25 = arith.constant 0 : index
    %46 = vector.load %arg5[%c0_23, %c0_24, %c0_25] : memref<2x16x16xf32, #tpu.memory_space<vmem>>, vector<1x16x16xf32>
    %47 = vector.shape_cast %46 : vector<1x16x16xf32> to vector<16x16xf32>
    %cst_26 = arith.constant dense<0.000000e+00> : vector<8x16xf32>
    %48 = tpu.matmul %45, %47, %cst_26 {dimension_numbers = #tpu.dot_dimension_numbers<[1], [0], [0], [1], [0, 0, 1, 1], [], []>} : vector<8x16xf32>, vector<16x16xf32>, vector<8x16xf32> -> vector<8x16xf32>
    %c1 = arith.constant 1 : index
    %c0_27 = arith.constant 0 : index
    %c0_28 = arith.constant 0 : index
    %49 = vector.load %arg2[%c1, %c0_27, %c0_28] : memref<2x16x16xf32, #tpu.memory_space<vmem>>, vector<1x16x16xf32>
    %50 = vector.shape_cast %49 : vector<1x16x16xf32> to vector<16x16xf32>
    %cst_29 = arith.constant dense<0.000000e+00> : vector<8x16xf32>
    %51 = tpu.matmul %0, %50, %cst_29 {dimension_numbers = #tpu.dot_dimension_numbers<[1], [0], [0], [1], [0, 0, 1, 1], [], []>} : vector<8x16xf32>, vector<16x16xf32>, vector<8x16xf32> -> vector<8x16xf32>
    %c1_30 = arith.constant 1 : index
    %c0_31 = arith.constant 0 : index
    %c0_32 = arith.constant 0 : index
    %52 = vector.load %arg3[%c1_30, %c0_31, %c0_32] : memref<2x1x16xf32, #tpu.memory_space<vmem>>, vector<1x1x16xf32>
    %53 = vector.shape_cast %52 : vector<1x1x16xf32> to vector<1x16xf32>
    %c1_33 = arith.constant 1 : index
    %c0_34 = arith.constant 0 : index
    %c0_35 = arith.constant 0 : index
    %54 = vector.load %arg4[%c1_33, %c0_34, %c0_35] : memref<2x1x16xf32, #tpu.memory_space<vmem>>, vector<1x1x16xf32>
    %55 = vector.shape_cast %54 : vector<1x1x16xf32> to vector<1x16xf32>
    %56 = vector.broadcast %53 : vector<1x16xf32> to vector<8x16xf32>
    %57 = arith.mulf %51, %56 : vector<8x16xf32>
    %cst_36 = arith.constant dense<0.000000e+00> : vector<8xf32>
    %58 = vector.multi_reduction <add>, %57, %cst_36 [1] : vector<8x16xf32> to vector<8xf32>
    %59 = vector.shape_cast %58 : vector<8xf32> to vector<8x1xf32>
    %60 = vector.broadcast %55 : vector<1x16xf32> to vector<8x16xf32>
    %61 = arith.mulf %51, %60 : vector<8x16xf32>
    %cst_37 = arith.constant dense<0.000000e+00> : vector<8xf32>
    %62 = vector.multi_reduction <add>, %61, %cst_37 [1] : vector<8x16xf32> to vector<8xf32>
    %63 = vector.shape_cast %62 : vector<8xf32> to vector<8x1xf32>
    %64 = tpu.transpose %63, [1, 0] : vector<8x1xf32> -> vector<1x8xf32>
    %65 = vector.broadcast %59 : vector<8x1xf32> to vector<8x8xf32>
    %66 = vector.broadcast %64 : vector<1x8xf32> to vector<8x8xf32>
    %67 = arith.addf %65, %66 : vector<8x8xf32>
    %cst_38 = arith.constant 0.00999999977 : f32
    %68 = vector.broadcast %cst_38 : f32 to vector<8x8xf32>
    %69 = arith.mulf %68, %67 : vector<8x8xf32>
    %70 = arith.maximumf %67, %69 : vector<8x8xf32>
    %cst_39 = arith.constant -9.000000e+15 : f32
    %71 = vector.broadcast %cst_39 : f32 to vector<8x8xf32>
    %72 = arith.select %3, %70, %71 : vector<8x8xi1>, vector<8x8xf32>
    %cst_40 = arith.constant dense<0xFF800000> : vector<8xf32>
    %73 = vector.multi_reduction <maximumf>, %72, %cst_40 [1] : vector<8x8xf32> to vector<8xf32>
    %74 = vector.shape_cast %73 : vector<8xf32> to vector<8x1xf32>
    %75 = vector.broadcast %74 : vector<8x1xf32> to vector<8x8xf32>
    %76 = arith.subf %72, %75 : vector<8x8xf32>
    %77 = math.exp %76 : vector<8x8xf32>
    %cst_41 = arith.constant dense<0.000000e+00> : vector<8xf32>
    %78 = vector.multi_reduction <add>, %77, %cst_41 [1] : vector<8x8xf32> to vector<8xf32>
    %79 = vector.shape_cast %78 : vector<8xf32> to vector<8x1xf32>
    %80 = vector.broadcast %79 : vector<8x1xf32> to vector<8x8xf32>
    %81 = arith.divf %77, %80 : vector<8x8xf32>
    %cst_42 = arith.constant dense<0.000000e+00> : vector<8x16xf32>
    %82 = tpu.matmul %81, %51, %cst_42 {dimension_numbers = #tpu.dot_dimension_numbers<[1], [0], [0], [1], [0, 0, 1, 1], [], []>} : vector<8x8xf32>, vector<8x16xf32>, vector<8x16xf32> -> vector<8x16xf32>
    %cst_43 = arith.constant 0.000000e+00 : f32
    %83 = vector.broadcast %cst_43 : f32 to vector<8x16xf32>
    %84 = arith.cmpf ogt, %82, %83 : vector<8x16xf32>
    %cst_44 = arith.constant 0.000000e+00 : f32
    %85 = vector.broadcast %cst_44 : f32 to vector<8x16xf32>
    %86 = arith.minimumf %82, %85 : vector<8x16xf32>
    %87 = math.exp %86 : vector<8x16xf32>
    %cst_45 = arith.constant 1.000000e+00 : f32
    %88 = vector.broadcast %cst_45 : f32 to vector<8x16xf32>
    %89 = arith.subf %87, %88 : vector<8x16xf32>
    %90 = arith.select %84, %82, %89 : vector<8x16xi1>, vector<8x16xf32>
    %c1_46 = arith.constant 1 : index
    %c0_47 = arith.constant 0 : index
    %c0_48 = arith.constant 0 : index
    %91 = vector.load %arg5[%c1_46, %c0_47, %c0_48] : memref<2x16x16xf32, #tpu.memory_space<vmem>>, vector<1x16x16xf32>
    %92 = vector.shape_cast %91 : vector<1x16x16xf32> to vector<16x16xf32>
    %cst_49 = arith.constant dense<0.000000e+00> : vector<8x16xf32>
    %93 = tpu.matmul %90, %92, %cst_49 {dimension_numbers = #tpu.dot_dimension_numbers<[1], [0], [0], [1], [0, 0, 1, 1], [], []>} : vector<8x16xf32>, vector<16x16xf32>, vector<8x16xf32> -> vector<8x16xf32>
    %94 = arith.addf %48, %93 : vector<8x16xf32>
    %c0_50 = arith.constant 0 : index
    %c0_51 = arith.constant 0 : index
    %95 = vector.load %arg6[%c0_50, %c0_51] : memref<1x16xf32, #tpu.memory_space<vmem>>, vector<1x16xf32>
    %c0_52 = arith.constant 0 : index
    %c0_53 = arith.constant 0 : index
    %96 = vector.load %arg7[%c0_52, %c0_53] : memref<1x16xf32, #tpu.memory_space<vmem>>, vector<1x16xf32>
    %97 = vector.broadcast %95 : vector<1x16xf32> to vector<8x16xf32>
    %98 = arith.mulf %94, %97 : vector<8x16xf32>
    %cst_54 = arith.constant dense<0.000000e+00> : vector<8xf32>
    %99 = vector.multi_reduction <add>, %98, %cst_54 [1] : vector<8x16xf32> to vector<8xf32>
    %100 = vector.shape_cast %99 : vector<8xf32> to vector<8x1xf32>
    %101 = vector.broadcast %96 : vector<1x16xf32> to vector<8x16xf32>
    %102 = arith.mulf %94, %101 : vector<8x16xf32>
    %cst_55 = arith.constant dense<0.000000e+00> : vector<8xf32>
    %103 = vector.multi_reduction <add>, %102, %cst_55 [1] : vector<8x16xf32> to vector<8xf32>
    %104 = vector.shape_cast %103 : vector<8xf32> to vector<8x1xf32>
    %105 = tpu.transpose %104, [1, 0] : vector<8x1xf32> -> vector<1x8xf32>
    %106 = vector.broadcast %100 : vector<8x1xf32> to vector<8x8xf32>
    %107 = vector.broadcast %105 : vector<1x8xf32> to vector<8x8xf32>
    %108 = arith.addf %106, %107 : vector<8x8xf32>
    %cst_56 = arith.constant 0.00999999977 : f32
    %109 = vector.broadcast %cst_56 : f32 to vector<8x8xf32>
    %110 = arith.mulf %109, %108 : vector<8x8xf32>
    %111 = arith.maximumf %108, %110 : vector<8x8xf32>
    %cst_57 = arith.constant -9.000000e+15 : f32
    %112 = vector.broadcast %cst_57 : f32 to vector<8x8xf32>
    %113 = arith.select %3, %111, %112 : vector<8x8xi1>, vector<8x8xf32>
    %cst_58 = arith.constant dense<0xFF800000> : vector<8xf32>
    %114 = vector.multi_reduction <maximumf>, %113, %cst_58 [1] : vector<8x8xf32> to vector<8xf32>
    %115 = vector.shape_cast %114 : vector<8xf32> to vector<8x1xf32>
    %116 = vector.broadcast %115 : vector<8x1xf32> to vector<8x8xf32>
    %117 = arith.subf %113, %116 : vector<8x8xf32>
    %118 = math.exp %117 : vector<8x8xf32>
    %cst_59 = arith.constant dense<0.000000e+00> : vector<8xf32>
    %119 = vector.multi_reduction <add>, %118, %cst_59 [1] : vector<8x8xf32> to vector<8xf32>
    %120 = vector.shape_cast %119 : vector<8xf32> to vector<8x1xf32>
    %121 = vector.broadcast %120 : vector<8x1xf32> to vector<8x8xf32>
    %122 = arith.divf %118, %121 : vector<8x8xf32>
    %cst_60 = arith.constant dense<0.000000e+00> : vector<8x16xf32>
    %123 = tpu.matmul %122, %94, %cst_60 {dimension_numbers = #tpu.dot_dimension_numbers<[1], [0], [0], [1], [0, 0, 1, 1], [], []>} : vector<8x8xf32>, vector<8x16xf32>, vector<8x16xf32> -> vector<8x16xf32>
    %cst_61 = arith.constant 0.000000e+00 : f32
    %124 = vector.broadcast %cst_61 : f32 to vector<8x16xf32>
    %125 = arith.cmpf ogt, %123, %124 : vector<8x16xf32>
    %cst_62 = arith.constant 0.000000e+00 : f32
    %126 = vector.broadcast %cst_62 : f32 to vector<8x16xf32>
    %127 = arith.minimumf %123, %126 : vector<8x16xf32>
    %128 = math.exp %127 : vector<8x16xf32>
    %cst_63 = arith.constant 1.000000e+00 : f32
    %129 = vector.broadcast %cst_63 : f32 to vector<8x16xf32>
    %130 = arith.subf %128, %129 : vector<8x16xf32>
    %131 = arith.select %125, %123, %130 : vector<8x16xi1>, vector<8x16xf32>
    %c0_64 = arith.constant 0 : index
    %c0_65 = arith.constant 0 : index
    %132 = vector.load %arg8[%c0_64, %c0_65] : memref<16x16xf32, #tpu.memory_space<vmem>>, vector<16x16xf32>
    %cst_66 = arith.constant dense<0.000000e+00> : vector<8x16xf32>
    %133 = tpu.matmul %131, %132, %cst_66 {dimension_numbers = #tpu.dot_dimension_numbers<[1], [0], [0], [1], [0, 0, 1, 1], [], []>} : vector<8x16xf32>, vector<16x16xf32>, vector<8x16xf32> -> vector<8x16xf32>
    %c0_67 = arith.constant 0 : index
    %c0_68 = arith.constant 0 : index
    %134 = vector.load %arg9[%c0_67, %c0_68] : memref<1x16xf32, #tpu.memory_space<vmem>>, vector<1x16xf32>
    %135 = vector.broadcast %134 : vector<1x16xf32> to vector<8x16xf32>
    %136 = arith.addf %133, %135 : vector<8x16xf32>
    %cst_69 = arith.constant 5.000000e-01 : f32
    %137 = vector.broadcast %cst_69 : f32 to vector<8x16xf32>
    %138 = arith.mulf %137, %136 : vector<8x16xf32>
    %cst_70 = arith.constant 0.707106769 : f32
    %139 = vector.broadcast %cst_70 : f32 to vector<8x16xf32>
    %140 = arith.mulf %136, %139 : vector<8x16xf32>
    %141 = math.erf %140 : vector<8x16xf32>
    %cst_71 = arith.constant 1.000000e+00 : f32
    %142 = vector.broadcast %cst_71 : f32 to vector<8x16xf32>
    %143 = arith.addf %142, %141 : vector<8x16xf32>
    %144 = arith.mulf %138, %143 : vector<8x16xf32>
    %c0_72 = arith.constant 0 : index
    %c0_73 = arith.constant 0 : index
    %145 = vector.load %arg10[%c0_72, %c0_73] : memref<16x128xf32, #tpu.memory_space<vmem>>, vector<16x128xf32>
    %cst_74 = arith.constant dense<0.000000e+00> : vector<8x128xf32>
    %146 = tpu.matmul %144, %145, %cst_74 {dimension_numbers = #tpu.dot_dimension_numbers<[1], [0], [0], [1], [0, 0, 1, 1], [], []>} : vector<8x16xf32>, vector<16x128xf32>, vector<8x128xf32> -> vector<8x128xf32>
    %c0_75 = arith.constant 0 : index
    %c0_76 = arith.constant 0 : index
    %147 = vector.load %arg11[%c0_75, %c0_76] : memref<1x128xf32, #tpu.memory_space<vmem>>, vector<1x128xf32>
    %148 = vector.broadcast %147 : vector<1x128xf32> to vector<8x128xf32>
    %149 = arith.addf %146, %148 : vector<8x128xf32>
    %c0_77 = arith.constant 0 : index
    %c0_78 = arith.constant 0 : index
    %150 = vector.load %arg12[%c0_77, %c0_78] : memref<8x128xf32, #tpu.memory_space<vmem>>, vector<8x128xf32>
    tpu.vector_store %arg12[%c0_77, %c0_78], %149 {strides = array<i32>} : memref<8x128xf32, #tpu.memory_space<vmem>>, vector<8x128xf32>,
    return
  }
}

</mosaic_0001>

<bundles_post_ra>
// kernel: tpu_custom_call.1
= control target key start
LH: loop header
LB: loop body
LE: loop exit
PB: predicated region body
PF: predicated region fallthrough
CT: control target
= control target key end

     0   :  { %17 = vsyncpa [#allocation3], 0  ;;  %s1658_s0 = inlined_call_operand.hbm [shape: f32[8,16], index: 0, kind: input, shape index: {}]   ;;  %s1659_s1 = inlined_call_operand.hbm [shape: f32[8,8], index: 1, kind: input, shape index: {}]   ;;  %s1660_s2 = inlined_call_operand.hbm [shape: f32[2,16,16], index: 2, kind: input, shape index: {}]   ;;  %s1661_s3 = inlined_call_operand.vmem [shape: f32[2,1,16], index: 3, kind: input, shape index: {}]   ;;  %s1662_s4 = inlined_call_operand.hbm [shape: f32[2,1,16], index: 4, kind: input, shape index: {}]   ;;  %s1663_s5 = inlined_call_operand.hbm [shape: f32[2,16,16], index: 5, kind: input, shape index: {}]   ;;  %s1664_s6 = inlined_call_operand.hbm [shape: f32[1,16], index: 6, kind: input, shape index: {}]   ;;  %s1665_s7 = inlined_call_operand.hbm [shape: f32[1,16], index: 7, kind: input, shape index: {}]   ;;  %s1666_s8 = inlined_call_operand.hbm [shape: f32[16,16], index: 8, kind: input, shape index: {}]   ;;  %s1667_s9 = inlined_call_operand.hbm [shape: f32[1,16], index: 9, kind: input, shape index: {}]   ;;  %s1668_s10 = inlined_call_operand.vmem [shape: f32[16,128], index: 10, kind: input, shape index: {}]   ;;  %s1669_s11 = inlined_call_operand.vmem [shape: f32[1,128], index: 11, kind: input, shape index: {}]   ;;  %s1670_s12 = inlined_call_operand.hbm [shape: f32[8,128], index: 12, kind: output, shape index: {}]  }
   0x1   :  { %18 = vsyncpa [#allocation6], 0 }
   0x2   :  { %19 = vsyncpa [#allocation9], 0 }
   0x3   :  { %20 = vsyncpa [#allocation12], 0 }
   0x4   :  { %21 = vsyncpa [#allocation15], 0 }
   0x5   :  { %22 = vsyncpa [#allocation4], 0  ;;  %s1455_s21 = smov [#allocation5]   ;;  %s1456_s23 = smov [#allocation8]  }
   0x6   :  { %s39_s22 = sshll.u32 %s1455_s21, 4  ;;  %s62_s24 = sshll.u32 %s1456_s23, 4  ;;  %s40_s22 = int_to_ptr.vmem [resolvable:$true] %s39_s22  ;;  %s63_s24 = int_to_ptr.vmem [resolvable:$true] %s62_s24 }
   0x7   :  { %s1251_s25 = scalar_lea.vmem %s40_s22, 128  ;;  %p1256_p1 = scmp.lt.s32.totalorder %s40_s22, %s40_s22 }
   0x8   :  { %p1252_p0 = scmp.ne.s32.totalorder %s40_s22, %s1251_s25  ;;  %p1257_p2 = scmp.lt.s32.totalorder %s1251_s25, %s1251_s25 }
   0xa   :  { %p1258_p3 = por %p1257_p2, %p1256_p1 }
   0xc   :  { %p1259_p4 = pnand %p1258_p3, %p1252_p0 }
   0xe   :  { %1262 = shalt.err (!%p1259_p4)
}
   0xf   :  { %42 = dma.hbm_to_vmem [thread:$0]  %s1659_s1, 128, %s40_s22, [#allocation6]  }
  0x10   :  { %s1271_s28 = scalar_lea.vmem %s63_s24, 32  ;;  %p1276_p6 = scmp.lt.s32.totalorder %s63_s24, %s63_s24 }
  0x11   :  { %p1272_p5 = scmp.ne.s32.totalorder %s63_s24, %s1271_s28  ;;  %p1277_p7 = scmp.lt.s32.totalorder %s1271_s28, %s1271_s28 }
  0x13   :  { %p1278_p8 = por %p1277_p7, %p1276_p6 }
  0x15   :  { %p1279_p9 = pnand %p1278_p8, %p1272_p5 }
  0x17   :  { %1282 = shalt.err (!%p1279_p9)
}
  0x18   :  { %s1457_s29 = smov 16   ;;  %s1458_s30 = smov 1  }
  0x19   :  { %68 = dma.hbm_to_vmem [thread:$0]  %s1662_s4, 32, %s63_s24, [#allocation9], %s1457_s29, %s1457_s29, %s1458_s30  }
  0x1a   :  { %s1459_s15 = smov [#allocation11]  }
  0x1b   :  { %s87_s16 = sshll.u32 %s1459_s15, 4  ;;  %s88_s16 = int_to_ptr.vmem [resolvable:$true] %s87_s16 }
  0x1c   :  { %s1291_s17 = scalar_lea.vmem %s88_s16, 16  ;;  %s1295_s18 = scalar_lea.vmem %s88_s16, 32 }
  0x1d   :  { %p1292_p10 = scmp.ne.s32.totalorder %s88_s16, %s1291_s17  ;;  %p1296_p11 = scmp.lt.s32.totalorder %s88_s16, %s88_s16 }
  0x1e   :  { %p1297_p12 = scmp.lt.s32.totalorder %s1295_s18, %s1291_s17 }
  0x20   :  { %p1298_p13 = por %p1297_p12, %p1296_p11 }
  0x22   :  { %p1299_p0 = pnand %p1298_p13, %p1292_p10 }
  0x24   :  { %1302 = shalt.err (!%p1299_p0)
}
  0x25   :  { %90 = dma.hbm_to_vmem [thread:$0]  %s1664_s6, 16, %s88_s16, [#allocation12]  }
  0x26   :  { %s1460_s20 = smov [#allocation14]   ;;  %s1461_s22 = smov [#allocation2]  }
  0x27   :  { %s106_s21 = sshll.u32 %s1460_s20, 4  ;;  %s29_s4 = sshll.u32 %s1461_s22, 4  ;;  %s107_s21 = int_to_ptr.vmem [resolvable:$true] %s106_s21  ;;  %s30_s4 = int_to_ptr.vmem [resolvable:$true] %s29_s4 }
  0x28   :  { %s1311_s23 = scalar_lea.vmem %s107_s21, 256  ;;  %p1316_p2 = scmp.lt.s32.totalorder %s107_s21, %s107_s21 }
  0x29   :  { %p1312_p1 = scmp.ne.s32.totalorder %s107_s21, %s1311_s23  ;;  %p1317_p3 = scmp.lt.s32.totalorder %s1311_s23, %s1311_s23 }
  0x2b   :  { %p1318_p4 = por %p1317_p3, %p1316_p2 }
  0x2d   :  { %p1319_p5 = pnand %p1318_p4, %p1312_p1 }
  0x2f   :  { %1322 = shalt.err (!%p1319_p5)
}
  0x30   :  { %s1462_s24 = smov 128   ;;  %s1463_s25 = smov 8  }
  0x31   :  { %112 = dma.hbm_to_vmem [thread:$0]  %s1666_s8, 256, %s107_s21, [#allocation15], %s1462_s24, %s1462_s24, %s1463_s25  }
  0x32   :  { %s1331_s6 = scalar_lea.vmem %s30_s4, 128  ;;  %p1336_p7 = scmp.lt.s32.totalorder %s30_s4, %s30_s4 }
  0x33   :  { %p1332_p6 = scmp.ne.s32.totalorder %s30_s4, %s1331_s6  ;;  %p1337_p8 = scmp.lt.s32.totalorder %s1331_s6, %s1331_s6 }
  0x35   :  { %p1338_p9 = por %p1337_p8, %p1336_p7 }
  0x37   :  { %p1339_p10 = pnand %p1338_p9, %p1332_p6 }
  0x39   :  { %1342 = shalt.err (!%p1339_p10)
}
  0x3a   :  { %32 = dma.hbm_to_vmem [thread:$0]  %s1658_s0, 128, %s30_s4, [#allocation3]  }
  0x3b   :  { %s1464_s30 = smov [#allocation7]   ;;  %s1465_s14 = smov [#allocation10]  }
  0x3c   :  { %s48_s13 = sshll.u32 %s1464_s30, 4  ;;  %s74_s15 = sshll.u32 %s1465_s14, 4  ;;  %s49_s13 = int_to_ptr.vmem [resolvable:$true] %s48_s13  ;;  %s75_s15 = int_to_ptr.vmem [resolvable:$true] %s74_s15 }
  0x3d   :  { %s1351_s16 = scalar_lea.vmem %s49_s13, 512  ;;  %p1356_p12 = scmp.lt.s32.totalorder %s49_s13, %s49_s13 }
  0x3e   :  { %p1352_p11 = scmp.ne.s32.totalorder %s49_s13, %s1351_s16  ;;  %p1357_p13 = scmp.lt.s32.totalorder %s1351_s16, %s1351_s16 }
  0x40   :  { %p1358_p0 = por %p1357_p13, %p1356_p12 }
  0x42   :  { %p1359_p1 = pnand %p1358_p0, %p1352_p11 }
  0x44   :  { %1362 = shalt.err (!%p1359_p1)
}
  0x45   :  { %54 = dma.hbm_to_vmem [thread:$0]  %s1660_s2, 512, %s49_s13, [#allocation6], %s1462_s24, %s1462_s24, %s1463_s25  }
  0x46   :  { %s1371_s0 = scalar_lea.vmem %s75_s15, 512  ;;  %p1376_p3 = scmp.lt.s32.totalorder %s75_s15, %s75_s15 }
  0x47   :  { %p1372_p2 = scmp.ne.s32.totalorder %s75_s15, %s1371_s0  ;;  %p1377_p4 = scmp.lt.s32.totalorder %s1371_s0, %s1371_s0 }
  0x49   :  { %p1378_p5 = por %p1377_p4, %p1376_p3 }
  0x4b   :  { %p1379_p6 = pnand %p1378_p5, %p1372_p2 }
  0x4d   :  { %1382 = shalt.err (!%p1379_p6)
}
  0x4e   :  { %80 = dma.hbm_to_vmem [thread:$0]  %s1663_s5, 512, %s75_s15, [#allocation9], %s1462_s24, %s1462_s24, %s1463_s25  }
  0x4f   :  { %s1466_s19 = smov [#allocation13]   ;;  %s1467_s21 = smov [#allocation16]  }
  0x50   :  { %s97_s20 = sshll.u32 %s1466_s19, 4  ;;  %s119_s2 = sshll.u32 %s1467_s21, 4  ;;  %s98_s20 = int_to_ptr.vmem [resolvable:$true] %s97_s20  ;;  %s120_s2 = int_to_ptr.vmem [resolvable:$true] %s119_s2 }
  0x51   :  { %s1391_s22 = scalar_lea.vmem %s98_s20, 16  ;;  %s1395_s4 = scalar_lea.vmem %s98_s20, 32 }
  0x52   :  { %p1392_p7 = scmp.ne.s32.totalorder %s98_s20, %s1391_s22  ;;  %p1396_p8 = scmp.lt.s32.totalorder %s98_s20, %s98_s20 }
  0x53   :  { %p1397_p9 = scmp.lt.s32.totalorder %s1395_s4, %s1391_s22 }
  0x55   :  { %p1398_p10 = por %p1397_p9, %p1396_p8 }
  0x57   :  { %p1399_p11 = pnand %p1398_p10, %p1392_p7 }
  0x59   :  { %1402 = shalt.err (!%p1399_p11)
}
  0x5a   :  { %100 = dma.hbm_to_vmem [thread:$0]  %s1665_s7, 16, %s98_s20, [#allocation12]  }
  0x5b   :  { %s1411_s27 = scalar_lea.vmem %s120_s2, 16  ;;  %s1415_s5 = scalar_lea.vmem %s120_s2, 32 }
  0x5c   :  { %p1412_p12 = scmp.ne.s32.totalorder %s120_s2, %s1411_s27  ;;  %p1416_p13 = scmp.lt.s32.totalorder %s120_s2, %s120_s2 }
  0x5d   :  { %p1417_p0 = scmp.lt.s32.totalorder %s1415_s5, %s1411_s27 }
  0x5f   :  { %p1418_p1 = por %p1417_p0, %p1416_p13 }
  0x61   :  { %p1419_p2 = pnand %p1418_p1, %p1412_p12 }
  0x63   :  { %1422 = shalt.err (!%p1419_p2)
}
  0x64   :  { %122 = dma.hbm_to_vmem [thread:$0]  %s1667_s9, 16, %s120_s2, [#allocation15]  }
  0x65   :  { %1443 = dma.done.wait [#allocation3], 128  }
  0x66   :  { %1444 = vsyncadd [#allocation3], 4294967168 }
  0x67   :  { %1445 = dma.done.wait [#allocation6], 640  }
  0x68   :  { %1446 = vsyncadd [#allocation6], 4294966656 }
  0x69   :  { %1447 = dma.done.wait [#allocation9], 544  }
  0x6a   :  { %1448 = vsyncadd [#allocation9], 4294966752 }
  0x6b   :  { %1449 = dma.done.wait [#allocation12], 32  }
  0x6c   :  { %1450 = vsyncadd [#allocation12], 4294967264 }
  0x6d   :  { %1451 = dma.done.wait [#allocation15], 272  }
  0x6e   :  { %1452 = vsyncadd [#allocation15], 4294967024  ;;  %v1468_v0 = vmov 0.0   ;;  %vm1469_vm0 = vmmov 0   ;;  %v158_v1 = vld [vmem:[#allocation7 + $0x8] sm:$0xff]  ;;  %v157_v2 = vld [vmem:[#allocation7] sm:$0xff]  ;;  %v287_v13 = vlaneseq }
  0x6f   :  { %1150 = vmatprep.subr.mxu0 %v1468_v0  ;;  %1154 = vmatprep.mubr.msk.f32.mxu0 %vm1469_vm0, %v1468_v0  ;;  %v154_v3 = vld [vmem:[#allocation2] sm:$0xff]  ;;  %vm159_vm1 = vcmask 130048   ;;  %v1107_v4 = vld [vmem:[#allocation8] ss:$0 sm:$0xff]  ;;  %v1592_v20 = vld [vmem:[#allocation5] sm:$0xff]  ;;  %vm295_vm3 = vcmask 64512  }
  0x70   :  { %1157 = vmatprep.subr.mxu1 %v1468_v0  ;;  %1159 = vmatprep.mubr.msk.f32.mxu1 %vm1469_vm0, %v1468_v0  ;;  %v1106_v6 = vld [vmem:[%s1661_s3] ss:$0 sm:$0xff]  ;;  %v288_v14 = vshrl.u32 %v287_v13, 7  ;;  %vm156_vm2 = vcmp.gt.f32.partialorder %v1592_v20, 0.0  ;;  %v390_v33 = vld [vmem:[#allocation7 + $0x18] sm:$0xff]  ;;  %v389_v34 = vld [vmem:[#allocation7 + $0x10] sm:$0xff] }
  0x71   :  { %1151 = vmatpush3.msra.mxu0 %v158_v1  ;;  %v1113_v37 = vld [vmem:[#allocation8 + $0x1] ss:$0 sm:$0xff]  ;;  %v917_v20 = vld [vmem:[#allocation14 + $0x8] sm:$0xff]  ;;  %s1470_s16 = smov [#allocation17]  }
  0x72   :  { %1152 = vmatprep.subr.mxu0 %v1468_v0  ;;  %v1589_v15 = vsub.s32 0, %v288_v14  ;;  %v1112_v39 = vld [vmem:[%s1661_s3 + $0x1] ss:$0 sm:$0xff]  ;;  %s1092_s8 = sshll.u32 %s1470_s16, 4  ;;  %s1093_s8 = int_to_ptr.vmem [resolvable:$true] %s1092_s8 }
  0x73   :  { %1153 = vmatpush3.msra.mxu0 %v157_v2  ;;  %v387_v2 = vld [vmem:[#allocation10 + $0x8] sm:$0xff]  ;;  %p1428_p4 = scmp.lt.s32.totalorder %s1093_s8, %s1093_s8 }
  0x74   :  { %1155 = vmatmul.mubr.msk.f32.vlgmr.msra.gmra.mxu0 %vm159_vm1, %v154_v3  ;;  %1169 = vmatprep.subr.mxu0 %v1468_v0 }
  0x75   :  { %1171 = vmatprep.mubr.msk.f32.mxu0 %vm1469_vm0, %v1468_v0 }
 0x134   :  { %v229_v5 = vpop.f32.mrf.mxu0 }
 0x135   :  { %1158 = vmatpush3.msra.mxu1 %v229_v5  ;;  %v251_v7 = vmul.f32 %v1107_v4, %v229_v5  ;;  %v241_v10 = vmul.f32 %v1106_v6, %v229_v5  ;;  %v386_v4 = vld [vmem:[#allocation10] sm:$0xff]  ;;  %v617_v6 = vld [vmem:[#allocation10 + $0x18] sm:$0xff] }
 0x136   :  { %v1156_v8 = vpop.f32.mrf.mxu0  ;;  %1162 = vmatprep.subr.mxu1 %v1468_v0 }
 0x137   :  { %v252_v9 = vsel %vm159_vm1, %v251_v7, 0.0  ;;  %v242_v11 = vsel %vm159_vm1, %v241_v10, 0.0  ;;  %v616_v7 = vld [vmem:[#allocation10 + $0x10] sm:$0xff] }
 0x138   :  { %253 = vadd.xlane.f32.xlu0 %v252_v9 }
 0x13c   :  { %243 = vadd.xlane.f32.xlu0 %v242_v11 }
 0x1c1   :  { %v254_v12 = vpop.xlane.xlu0 %253 }
 0x1c2   :  { %255 = vxpose.xlu1.b32.start.end [1/1] (short) (narrow) %v254_v12, 8 }
 0x1c5   :  { %v244_v18 = vpop.xlane.xlu0 %243 }
 0x23e   :  { %v271_v16 = vpop.trf.xlu1 }
 0x23f   :  { %v290_v17 = vrot.slane %v271_v16, %v1589_v15 }
 0x241   :  { %v291_v19 = vadd.f32 %v290_v17, %v244_v18 }
 0x243   :  { %v292_v21 = vmul.f32 0.01, %v291_v19 }
 0x245   :  { %v293_v22 = vmax.f32 %v291_v19, %v292_v21  ;;  %v1119_v19 = vld [vmem:[#allocation13] ss:$0 sm:$0xff] }
 0x247   :  { %v294_v23 = vsel %vm156_vm2, %v293_v22, -9e+15 }
 0x248   :  { %v296_v24 = vsel %vm295_vm3, %v294_v23, -inf }
 0x249   :  { %297 = vmax.xlane.f32.xlu1 %v296_v24 }
 0x2d2   :  { %v298_v25 = vpop.xlane.xlu1 %297 }
 0x2d3   :  { %v299_v26 = vsub.f32 %v294_v23, %v298_v25  ;;  %v1118_v23 = vld [vmem:[#allocation11] ss:$0 sm:$0xff] }
 0x2d5   :  { %v300_v27 = vmul.f32 1.442695, %v299_v26 }
 0x2d7   :  { %1223 = vpow2.f32 %v300_v27 }
 0x2e4   :  { %v1224_v28 = vpop.eup %1223 }
 0x2e5   :  { %v302_v29 = vsel %vm295_vm3, %v1224_v28, 0.0 }
 0x2e6   :  { %303 = vadd.xlane.f32.xlu0 %v302_v29 }
 0x36f   :  { %v304_v30 = vpop.xlane.xlu0 %303 }
 0x370   :  { %1225 = vrcp.f32 %v304_v30 }
 0x37d   :  { %v1226_v31 = vpop.eup %1225 }
 0x37e   :  { %v306_v32 = vmul.f32 %v1226_v31, %v1224_v28 }
 0x380   :  { %1160 = vmatmul.mubr.msk.f32.vlgmr.msra.gmra.mxu1 %vm295_vm3, %v306_v32 }
 0x381   :  { %1163 = vmatpush3.msra.mxu1 %v390_v33  ;;  %1166 = vmatprep.mubr.msk.f32.mxu1 %vm1469_vm0, %v1468_v0 }
 0x382   :  { %1164 = vmatprep.subr.mxu1 %v1468_v0 }
 0x383   :  { %1165 = vmatpush3.msra.mxu1 %v389_v34 }
 0x384   :  { %1167 = vmatmul.mubr.msk.f32.vlgmr.msra.gmra.mxu1 %vm159_vm1, %v154_v3  ;;  %1174 = vmatprep.subr.mxu1 %v1468_v0 }
 0x385   :  { %1178 = vmatprep.mubr.msk.f32.mxu1 %vm1469_vm0, %v1468_v0  ;;  %1175 = vmatpush3.msra.mxu1 %v617_v6 }
 0x386   :  { %1176 = vmatprep.subr.mxu1 %v1468_v0 }
 0x387   :  { %1177 = vmatpush3.msra.mxu1 %v616_v7 }
 0x388   :  { %1188 = vmatprep.subr.mxu1 %v1468_v0 }
 0x440   :  { %v376_v35 = vpop.f32.mrf.mxu1 }
 0x441   :  { %v381_v59 = vmin.f32 %v376_v35, 0.0  ;;  %vm380_vm4 = vcmp.gt.f32.partialorder %v376_v35, 0.0 }
 0x442   :  { %v1161_v36 = vpop.f32.mrf.mxu1 }
 0x443   :  { %v382_v60 = vmul.f32 1.442695, %v381_v59 }
 0x444   :  { %v457_v38 = vpop.f32.mrf.mxu1 }
 0x445   :  { %1170 = vmatpush3.msra.mxu0 %v457_v38  ;;  %v481_v40 = vmul.f32 %v1113_v37, %v457_v38  ;;  %v471_v43 = vmul.f32 %v1112_v39, %v457_v38 }
 0x446   :  { %v1168_v41 = vpop.f32.mrf.mxu1  ;;  %1181 = vmatprep.subr.mxu0 %v1468_v0 }
 0x447   :  { %v482_v42 = vsel %vm159_vm1, %v481_v40, 0.0  ;;  %v472_v44 = vsel %vm159_vm1, %v471_v43, 0.0 }
 0x448   :  { %483 = vadd.xlane.f32.xlu0 %v482_v42 }
 0x44c   :  { %473 = vadd.xlane.f32.xlu0 %v472_v44  ;;  %v916_v44 = vld [vmem:[#allocation14] sm:$0xff] }
 0x4d1   :  { %v484_v45 = vpop.xlane.xlu0 %483 }
 0x4d2   :  { %485 = vxpose.xlu0.b32.start.end [1/1] (short) (narrow) %v484_v45, 8 }
 0x4d5   :  { %v474_v46 = vpop.xlane.xlu0 %473 }
 0x54e   :  { %v501_v47 = vpop.trf.xlu0 }
 0x54f   :  { %v520_v48 = vrot.slane %v501_v47, %v1589_v15 }
 0x551   :  { %v521_v49 = vadd.f32 %v520_v48, %v474_v46 }
 0x553   :  { %v522_v50 = vmul.f32 0.01, %v521_v49 }
 0x555   :  { %v523_v51 = vmax.f32 %v521_v49, %v522_v50 }
 0x557   :  { %v524_v52 = vsel %vm156_vm2, %v523_v51, -9e+15 }
 0x558   :  { %v525_v53 = vsel %vm295_vm3, %v524_v52, -inf }
 0x559   :  { %526 = vmax.xlane.f32.xlu1 %v525_v53  ;;  %v1003_v53 = vld [vmem:[%s1668_s10] sm:$0xff] }
 0x5e2   :  { %v527_v54 = vpop.xlane.xlu1 %526 }
 0x5e3   :  { %v528_v55 = vsub.f32 %v524_v52, %v527_v54  ;;  %v1004_v52 = vld [vmem:[%s1668_s10 + $0x8] sm:$0xff]  ;;  %v1122_v54 = vld [vmem:[#allocation16] ss:$0 sm:$0xff]  ;;  %s1423_s10 = scalar_lea.vmem %s1093_s8, 128 }
 0x5e4   :  { %p1424_p3 = scmp.ne.s32.totalorder %s1093_s8, %s1423_s10  ;;  %p1429_p5 = scmp.lt.s32.totalorder %s1423_s10, %s1423_s10 }
 0x5e5   :  { %v529_v56 = vmul.f32 1.442695, %v528_v55 }
 0x5e6   :  { %p1430_p6 = por %p1429_p5, %p1428_p4 }
 0x5e7   :  { %1227 = vpow2.f32 %v529_v56 }
 0x5e8   :  { %1229 = vpow2.f32 %v382_v60  ;;  %p1431_p7 = pnand %p1430_p6, %p1424_p3 }
 0x5f4   :  { %v1228_v57 = vpop.eup %1227 }
 0x5f5   :  { %v531_v58 = vsel %vm295_vm3, %v1228_v57, 0.0  ;;  %v1230_v62 = vpop.eup %1229 }
 0x5f6   :  { %532 = vadd.xlane.f32.xlu1 %v531_v58  ;;  %v1109_v3 = vadd.f32 -1.0, %v1230_v62 }
 0x5f8   :  { %v385_v5 = vsel %vm380_vm4, %v376_v35, %v1109_v3 }
 0x67f   :  { %v533_v61 = vpop.xlane.xlu1 %532 }
 0x680   :  { %1231 = vrcp.f32 %v533_v61 }
 0x68d   :  { %v1232_v63 = vpop.eup %1231 }
 0x68e   :  { %v535_v1 = vmul.f32 %v1232_v63, %v1228_v57 }
 0x690   :  { %1172 = vmatmul.mubr.msk.f32.vlgmr.msra.gmra.mxu0 %vm295_vm3, %v535_v1 }
 0x691   :  { %1182 = vmatpush3.msra.mxu0 %v387_v2  ;;  %1185 = vmatprep.mubr.msk.f32.mxu0 %vm1469_vm0, %v1468_v0 }
 0x692   :  { %1183 = vmatprep.subr.mxu0 %v1468_v0 }
 0x693   :  { %1184 = vmatpush3.msra.mxu0 %v386_v4 }
 0x694   :  { %1186 = vmatmul.mubr.msk.f32.vlgmr.msra.gmra.mxu0 %vm159_vm1, %v385_v5  ;;  %1193 = vmatprep.subr.mxu0 %v1468_v0 }
 0x695   :  { %1197 = vmatprep.mubr.msk.f32.mxu0 %vm1469_vm0, %v1468_v0  ;;  %1194 = vmatpush3.msra.mxu0 %v917_v20 }
 0x696   :  { %1195 = vmatprep.subr.mxu0 %v1468_v0 }
 0x697   :  { %1196 = vmatpush3.msra.mxu0 %v916_v44 }
 0x750   :  { %v605_v8 = vpop.f32.mrf.mxu0 }
 0x751   :  { %v610_v9 = vmin.f32 %v605_v8, 0.0  ;;  %vm609_vm5 = vcmp.gt.f32.partialorder %v605_v8, 0.0 }
 0x752   :  { %v1173_v10 = vpop.f32.mrf.mxu0 }
 0x753   :  { %v611_v11 = vmul.f32 1.442695, %v610_v9 }
 0x754   :  { %v760_v12 = vpop.f32.mrf.mxu0 }
 0x755   :  { %1233 = vpow2.f32 %v611_v11 }
 0x756   :  { %v1187_v13 = vpop.f32.mrf.mxu0 }
 0x762   :  { %v1234_v14 = vpop.eup %1233 }
 0x763   :  { %v1115_v16 = vadd.f32 -1.0, %v1234_v14 }
 0x765   :  { %v614_v17 = vsel %vm609_vm5, %v605_v8, %v1115_v16 }
 0x766   :  { %1179 = vmatmul.mubr.msk.f32.vlgmr.msra.gmra.mxu1 %vm159_vm1, %v614_v17 }
 0x767   :  { %1190 = vmatprep.mubr.msk.f32.mxu1 %vm1469_vm0, %v1468_v0 }
 0x826   :  { %v687_v18 = vpop.f32.mrf.mxu1 }
 0x827   :  { %v761_v21 = vadd.f32 %v760_v12, %v687_v18 }
 0x828   :  { %v1180_v22 = vpop.f32.mrf.mxu1 }
 0x829   :  { %1189 = vmatpush3.msra.mxu1 %v761_v21  ;;  %v782_v24 = vmul.f32 %v1119_v19, %v761_v21  ;;  %v772_v26 = vmul.f32 %v1118_v23, %v761_v21 }
 0x82a   :  { %1200 = vmatprep.subr.mxu1 %v1468_v0 }
 0x82b   :  { %v783_v25 = vsel %vm159_vm1, %v782_v24, 0.0  ;;  %v773_v27 = vsel %vm159_vm1, %v772_v26, 0.0 }
 0x82c   :  { %784 = vadd.xlane.f32.xlu1 %v783_v25 }
 0x830   :  { %774 = vadd.xlane.f32.xlu1 %v773_v27 }
 0x8b5   :  { %v785_v28 = vpop.xlane.xlu1 %784 }
 0x8b6   :  { %786 = vxpose.xlu1.b32.start.end [1/1] (short) (narrow) %v785_v28, 8 }
 0x8b9   :  { %v775_v29 = vpop.xlane.xlu1 %774 }
 0x932   :  { %v802_v30 = vpop.trf.xlu1 }
 0x933   :  { %v821_v31 = vrot.slane %v802_v30, %v1589_v15 }
 0x935   :  { %v822_v32 = vadd.f32 %v821_v31, %v775_v29 }
 0x937   :  { %v823_v33 = vmul.f32 0.01, %v822_v32 }
 0x939   :  { %v824_v34 = vmax.f32 %v822_v32, %v823_v33 }
 0x93b   :  { %v825_v35 = vsel %vm156_vm2, %v824_v34, -9e+15 }
 0x93c   :  { %v826_v36 = vsel %vm295_vm3, %v825_v35, -inf }
 0x93d   :  { %827 = vmax.xlane.f32.xlu0 %v826_v36 }
 0x9c6   :  { %v828_v37 = vpop.xlane.xlu0 %827 }
 0x9c7   :  { %v829_v38 = vsub.f32 %v825_v35, %v828_v37 }
 0x9c9   :  { %v830_v39 = vmul.f32 1.442695, %v829_v38 }
 0x9cb   :  { %1235 = vpow2.f32 %v830_v39 }
 0x9d8   :  { %v1236_v40 = vpop.eup %1235 }
 0x9d9   :  { %v832_v41 = vsel %vm295_vm3, %v1236_v40, 0.0 }
 0x9da   :  { %833 = vadd.xlane.f32.xlu0 %v832_v41 }
 0xa63   :  { %v834_v42 = vpop.xlane.xlu0 %833 }
 0xa64   :  { %1237 = vrcp.f32 %v834_v42 }
 0xa71   :  { %v1238_v15 = vpop.eup %1237 }
 0xa72   :  { %v836_v43 = vmul.f32 %v1238_v15, %v1236_v40 }
 0xa74   :  { %1191 = vmatmul.mubr.msk.f32.vlgmr.msra.gmra.mxu1 %vm295_vm3, %v836_v43 }
 0xa75   :  { %1204 = vmatprep.mubr.msk.f32.mxu1 %vm1469_vm0, %v1468_v0  ;;  %1201 = vmatpush3.msra.mxu1 %v1004_v52 }
 0xa76   :  { %1202 = vmatprep.subr.mxu1 %v1468_v0  ;;  %v1124_v0 = vld [vmem:[%s1669_s11] ss:$0 sm:$0xff] }
 0xa77   :  { %1203 = vmatpush3.msra.mxu1 %v1003_v53 }
 0xb34   :  { %v906_v45 = vpop.f32.mrf.mxu1 }
 0xb35   :  { %v911_v46 = vmin.f32 %v906_v45, 0.0  ;;  %vm910_vm6 = vcmp.gt.f32.partialorder %v906_v45, 0.0 }
 0xb36   :  { %v1192_v47 = vpop.f32.mrf.mxu1 }
 0xb37   :  { %v912_v48 = vmul.f32 1.442695, %v911_v46 }
 0xb39   :  { %1239 = vpow2.f32 %v912_v48 }
 0xb46   :  { %v1240_v49 = vpop.eup %1239 }
 0xb47   :  { %v1121_v50 = vadd.f32 -1.0, %v1240_v49 }
 0xb49   :  { %v915_v51 = vsel %vm910_vm6, %v906_v45, %v1121_v50 }
 0xb4a   :  { %1198 = vmatmul.mubr.msk.f32.vlgmr.msra.gmra.mxu0 %vm159_vm1, %v915_v51 }
 0xc0a   :  { %v994_v55 = vpop.f32.mrf.mxu0 }
 0xc0b   :  { %v995_v56 = vadd.f32 %v1122_v54, %v994_v55 }
 0xc0c   :  { %v1199_v57 = vpop.f32.mrf.mxu0 }
 0xc0d   :  { %v999_v58 = vmul.f32 0.70710677, %v995_v56  ;;  %v998_v60 = vmul.f32 0.5, %v995_v56 }
 0xc0f   :  { %1241 = verf.f32 %v999_v58 }
 0xc1c   :  { %v1242_v59 = vpop.eup %1241 }
 0xc1d   :  { %v1001_v61 = vadd.f32 1.0, %v1242_v59 }
 0xc1f   :  { %v1002_v62 = vmul.f32 %v1001_v61, %v998_v60 }
 0xc21   :  { %1205 = vmatmul.mubr.msk.f32.vlgmr.msra.gmra.mxu1 %vm159_vm1, %v1002_v62 }
 0xce1   :  { %v1081_v63 = vpop.f32.mrf.mxu1 }
 0xce2   :  { %v1082_v1 = vadd.f32 %v1124_v0, %v1081_v63 }
 0xce3   :  { %v1206_v2 = vpop.f32.mrf.mxu1 }
 0xce4   :  { %1085 = vst [vmem:[#allocation17] sm:$0xff] %v1082_v1 }
 0xce5   :  { %1434 = shalt.err (!%p1431_p7)
}
 0xce6   :  { %1095 = dma.vmem_to_hbm [thread:$0]  %s1093_s8, 128, %s1670_s12, [#allocation4]  }
 0xce7   :  { %1453 = dma.done.wait [#allocation4], 128  }
 0xce8   :  { %1454 = vsyncadd [#allocation4], 4294967168 }
 0xce9   :  { %1099 = vsyncpa [#allocation3], 1 }
 0xcea   :  { %1100 = vsyncpa [#allocation6], 1 }
 0xceb   :  { %1101 = vsyncpa [#allocation9], 1 }
 0xcec   :  { %1102 = vsyncpa [#allocation12], 1 }
 0xced   :  { %1103 = vsyncpa [#allocation15], 1 }
 0xcee   :  { %1104 = vsyncpa [#allocation4], 1 }

</bundles_post_ra>
